<compile_context>
chip_gen: v7x
topology: tpu7x:2x2x1
jax: 0.10.0
libtpu: 0.0.40
codegen_flags: <defaults>
</compile_context>

<pallas_src>
import functools

import jax
import jax.numpy as jnp
from jax.experimental import pallas as pl
from jax.experimental.pallas import tpu as pltpu

NUM_CLASSES = 10  # hard-coded in the PyTorch forward (F.one_hot(..., num_classes=10))


def _round_up(n, m):
    return ((n + m - 1) // m) * m


def _label_smoothing_ce_kernel(x_ref, part_ref, *, smoothing, total_b, block_b):
    # x_ref    : (TB, C, N) float32 in VMEM -- native layout, classes on axis 1 (sublanes), N on lanes
    # part_ref : (1, 1)     float32 in SMEM -- this block's partial sum of per-row contributions
    confidence = 1.0 - smoothing

    x = x_ref[...]                                               # (TB, C, N)
    TB, C, N = x.shape

    # Numerically stable log_softmax over the class axis (axis=1).
    m = jnp.max(x, axis=1, keepdims=True)                        # (TB, 1, N)
    shifted = x - m
    lse = jnp.log(jnp.sum(jnp.exp(shifted), axis=1, keepdims=True))
    lp = shifted - lse                                           # (TB, C, N)

    # torch nll term: sum_k nll[b,k] = -(lp[b, c=1, n=0] + (NUM_CLASSES-1) * lp[b, c=0, n=0]).
    lp_c0_n0 = lp[:, 0, 0:1]                                     # (TB, 1)
    lp_c1_n0 = lp[:, 1, 0:1]                                     # (TB, 1)
    nll_rowsum = -(lp_c1_n0 + float(NUM_CLASSES - 1) * lp_c0_n0)  # (TB, 1)

    # smooth term: sum_n (-mean_c lp[b,:,n]) = -(1/C) * sum_{c,n} lp[b,c,n]
    smooth_rowsum = -(jnp.sum(jnp.sum(lp, axis=2), axis=1, keepdims=True) / float(C))  # (TB, 1)

    contrib = confidence * nll_rowsum + smoothing * smooth_rowsum  # (TB, 1)

    # Mask rows past the true batch size (zero-padded overhang in the last block).
    row = pl.program_id(0) * block_b + jax.lax.broadcasted_iota(jnp.int32, (TB, 1), 0)
    contrib = jnp.where(row < total_b, contrib, 0.0)

    part_ref[0, 0] = jnp.sum(contrib)


def label_smoothing_cross_entropy(x, target=None, smoothing=0.1, block_b=4096):
    """x: (B, C, N) float32 logits, target: (B,) int labels (unused, see header). Scalar loss."""
    B, C, N = x.shape
    # The torch broadcast (B,10) vs (B,N) silently requires N == 10; the gather needs C >= 2.
    assert N == NUM_CLASSES, f"torch broadcast requires N == {NUM_CLASSES}, got N={N}"
    assert C >= 2, "gather(index=one_hot) reads class indices 0 and 1"
    del target  # result is independent of target (torch gathers by one-hot *values* 0/1)

    x = x.astype(jnp.float32)

    block_b = max(1, min(int(block_b), B))
    b_padded = _round_up(B, block_b)
    if b_padded != B:
        x = jnp.pad(x, ((0, b_padded - B), (0, 0), (0, 0)))
    grid = b_padded // block_b

    kernel = functools.partial(
        _label_smoothing_ce_kernel,
        smoothing=float(smoothing),
        total_b=B,
        block_b=block_b,
    )
    parts = pl.pallas_call(
        kernel,
        out_shape=jax.ShapeDtypeStruct((grid, 1), jnp.float32),
        grid=(grid,),
        in_specs=[
            # Last two block dims equal the full array dims (C, N), so the (8,128) rule is satisfied.
            pl.BlockSpec((block_b, C, N), lambda g: (g, 0, 0)),
        ],
        out_specs=pl.BlockSpec((1, 1), lambda g: (g, 0), memory_space=pltpu.SMEM),
        compiler_params=pltpu.CompilerParams(dimension_semantics=("parallel",)),
    )(x)

    return jnp.sum(parts) / float(B * NUM_CLASSES)


def _reference_loss(x, target, smoothing=0.1):
    # Pure-JAX mirror of the torch forward, for a sanity check only.
    onehot = jax.nn.one_hot(target, NUM_CLASSES, dtype=jnp.int32)       # (B, 10)
    xp = jnp.transpose(x, (0, 2, 1))                                    # (B, N, C)
    lp = jax.nn.log_softmax(xp, axis=-1)
    idx = onehot[:, None, :]                                            # (B, 1, 10)
    nll = -jnp.take_along_axis(lp, idx, axis=-1)[:, 0, :]               # (B, 10)
    smooth = -jnp.mean(lp, axis=-1)                                     # (B, N)
    loss = (1.0 - smoothing) * nll + smoothing * smooth
    return jnp.mean(loss)


if __name__ == "__main__":
    key = jax.random.PRNGKey(0)
    kx, kt = jax.random.split(key)

    B, C, N = 4, NUM_CLASSES, NUM_CLASSES  # N must equal 10 for the torch broadcast to be valid
    x = jax.random.normal(kx, (B, C, N), dtype=jnp.float32)
    target = jax.random.randint(kt, (B,), 0, NUM_CLASSES, dtype=jnp.int32)

    loss = label_smoothing_cross_entropy(x, target, smoothing=0.1)
    loss = jax.block_until_ready(loss)

    ref = jax.block_until_ready(_reference_loss(x, target, smoothing=0.1))
    assert abs(float(loss) - float(ref)) < 1e-5, (float(loss), float(ref))

    print("KERNEL_OK")
</pallas_src>

<mosaic_0001>
module attributes {stable_mosaic.version = 11 : i64} {
  func.func @_label_smoothing_ce_kernel(%arg0: i32, %arg1: memref<4x10x10xf32, #tpu.memory_space<vmem>>, %arg2: memref<1x1xf32, #tpu.memory_space<smem>>) attributes {dimension_semantics = [#tpu.dimension_semantics<parallel>], iteration_bounds = array<i64: 1>, scalar_prefetch = 0 : i64, scratch_operands = 0 : i64, tpu.core_type = #tpu.core_type<tc>, window_params = [{transform_indices = @transform_0, window_bounds = array<i64: 4, 10, 10>}, {transform_indices = @transform_1, window_bounds = array<i64: 1, 1>}]} {
    %c0 = arith.constant 0 : index
    %c0_0 = arith.constant 0 : index
    %c0_1 = arith.constant 0 : index
    %0 = vector.load %arg1[%c0, %c0_0, %c0_1] : memref<4x10x10xf32, #tpu.memory_space<vmem>>, vector<4x10x10xf32>
    %cst = arith.constant dense<0xFF800000> : vector<4x10xf32>
    %1 = vector.multi_reduction <maximumf>, %0, %cst [1] : vector<4x10x10xf32> to vector<4x10xf32>
    %2 = vector.shape_cast %1 : vector<4x10xf32> to vector<4x1x10xf32>
    %3 = vector.broadcast %2 : vector<4x1x10xf32> to vector<4x10x10xf32>
    %4 = arith.subf %0, %3 : vector<4x10x10xf32>
    %5 = math.exp %4 : vector<4x10x10xf32>
    %cst_2 = arith.constant dense<0.000000e+00> : vector<4x10xf32>
    %6 = vector.multi_reduction <add>, %5, %cst_2 [1] : vector<4x10x10xf32> to vector<4x10xf32>
    %7 = vector.shape_cast %6 : vector<4x10xf32> to vector<4x1x10xf32>
    %8 = math.log %7 : vector<4x1x10xf32>
    %9 = vector.broadcast %8 : vector<4x1x10xf32> to vector<4x10x10xf32>
    %10 = arith.subf %4, %9 : vector<4x10x10xf32>
    %11 = vector.extract_strided_slice %10 {offsets = [0, 0, 0], sizes = [4, 1, 1], strides = [1, 1, 1]} : vector<4x10x10xf32> to vector<4x1x1xf32>
    %12 = vector.shape_cast %11 : vector<4x1x1xf32> to vector<4x1xf32>
    %13 = vector.extract_strided_slice %10 {offsets = [0, 1, 0], sizes = [4, 1, 1], strides = [1, 1, 1]} : vector<4x10x10xf32> to vector<4x1x1xf32>
    %14 = vector.shape_cast %13 : vector<4x1x1xf32> to vector<4x1xf32>
    %cst_3 = arith.constant 9.000000e+00 : f32
    %15 = vector.broadcast %cst_3 : f32 to vector<4x1xf32>
    %16 = arith.mulf %15, %12 : vector<4x1xf32>
    %17 = arith.addf %14, %16 : vector<4x1xf32>
    %cst_4 = arith.constant 0.000000e+00 : f32
    %18 = vector.broadcast %cst_4 : f32 to vector<4x1xf32>
    %19 = arith.subf %18, %17 : vector<4x1xf32>
    %cst_5 = arith.constant dense<0.000000e+00> : vector<4x10xf32>
    %20 = vector.multi_reduction <add>, %10, %cst_5 [2] : vector<4x10x10xf32> to vector<4x10xf32>
    %cst_6 = arith.constant dense<0.000000e+00> : vector<4xf32>
    %21 = vector.multi_reduction <add>, %20, %cst_6 [1] : vector<4x10xf32> to vector<4xf32>
    %22 = vector.shape_cast %21 : vector<4xf32> to vector<4x1xf32>
    %cst_7 = arith.constant 1.000000e+01 : f32
    %23 = vector.broadcast %cst_7 : f32 to vector<4x1xf32>
    %24 = arith.divf %22, %23 : vector<4x1xf32>
    %cst_8 = arith.constant 0.000000e+00 : f32
    %25 = vector.broadcast %cst_8 : f32 to vector<4x1xf32>
    %26 = arith.subf %25, %24 : vector<4x1xf32>
    %cst_9 = arith.constant 0.899999976 : f32
    %27 = vector.broadcast %cst_9 : f32 to vector<4x1xf32>
    %28 = arith.mulf %27, %19 : vector<4x1xf32>
    %cst_10 = arith.constant 1.000000e-01 : f32
    %29 = vector.broadcast %cst_10 : f32 to vector<4x1xf32>
    %30 = arith.mulf %29, %26 : vector<4x1xf32>
    %31 = arith.addf %28, %30 : vector<4x1xf32>
    %c4_i32 = arith.constant 4 : i32
    %32 = arith.muli %arg0, %c4_i32 : i32
    %33 = tpu.iota {dimensions = array<i32: 0>} : vector<4x1xi32>
    %34 = vector.broadcast %32 : i32 to vector<4x1xi32>
    %35 = arith.addi %34, %33 : vector<4x1xi32>
    %c4_i32_11 = arith.constant 4 : i32
    %36 = vector.broadcast %c4_i32_11 : i32 to vector<4x1xi32>
    %37 = arith.cmpi slt, %35, %36 : vector<4x1xi32>
    %cst_12 = arith.constant 0.000000e+00 : f32
    %38 = vector.broadcast %cst_12 : f32 to vector<4x1xf32>
    %39 = arith.select %37, %31, %38 : vector<4x1xi1>, vector<4x1xf32>
    %40 = vector.shape_cast %39 : vector<4x1xf32> to vector<1x4x1xf32>
    %cst_13 = arith.constant dense<0.000000e+00> : vector<1xf32>
    %41 = vector.multi_reduction <add>, %40, %cst_13 [1, 2] : vector<1x4x1xf32> to vector<1xf32>
    %42 = vector.shape_cast %41 : vector<1xf32> to vector<1x1x1xf32>
    %43 = vector.extract %42[0, 0, 0] : f32 from vector<1x1x1xf32>
    %c0_14 = arith.constant 0 : index
    %c0_15 = arith.constant 0 : index
    %44 = memref.load %arg2[%c0_14, %c0_15] : memref<1x1xf32, #tpu.memory_space<smem>>
    memref.store %43, %arg2[%c0_14, %c0_15] : memref<1x1xf32, #tpu.memory_space<smem>>
    return
  }
  func.func @transform_0(%arg0: i32) -> (i32, i32, i32) {
    %c0_i32 = arith.constant 0 : i32
    %c0_i32_0 = arith.constant 0 : i32
    %c0_i32_1 = arith.constant 0 : i32
    return %arg0, %c0_i32, %c0_i32_0 : i32, i32, i32
  }
  func.func @transform_1(%arg0: i32) -> (i32, i32) {
    %c0_i32 = arith.constant 0 : i32
    %c0_i32_0 = arith.constant 0 : i32
    return %arg0, %c0_i32 : i32, i32
  }
}

</mosaic_0001>

<bundles_post_ra>
// kernel: tpu_custom_call.1
= control target key start
LH: loop header
LB: loop body
LE: loop exit
PB: predicated region body
PF: predicated region fallthrough
CT: control target
= control target key end

     0   :  { %vm17_vm0 = vcmask 80896   ;;  %vm19_vm1 = vcmask 74752   ;;  %s469_s0 = inlined_call_operand.vmem [shape: f32[4,10,10], index: 0, kind: input, shape index: {}]   ;;  %s470_s1 = inlined_call_operand.hbm [shape: f32[1,1], index: 1, kind: output, shape index: {}]  }
   0x1   :  { %v11_v0 = vld [vmem:[%s469_s0 + $0x10] sm:$0xff]  ;;  %v12_v1 = vld [vmem:[%s469_s0 + $0x18] sm:$0x3]  ;;  %v9_v2 = vld [vmem:[%s469_s0] sm:$0xff] }
   0x2   :  { %v28_v3 = vsel %vm17_vm0, %v11_v0, -inf  ;;  %v29_v4 = vsel %vm19_vm1, %v12_v1, -inf  ;;  %v10_v5 = vld [vmem:[%s469_s0 + $0x8] sm:$0x3]  ;;  %v18_v6 = vsel %vm17_vm0, %v9_v2, -inf  ;;  %v13_v7 = vld [vmem:[%s469_s0 + $0x20] sm:$0xff] }
   0x3   :  { %v30_v8 = vmax.f32 %v28_v3, %v29_v4  ;;  %v20_v9 = vsel %vm19_vm1, %v10_v5, -inf  ;;  %v14_v10 = vld [vmem:[%s469_s0 + $0x28] sm:$0x3]  ;;  %v37_v11 = vsel %vm17_vm0, %v13_v7, -inf  ;;  %v15_v12 = vld [vmem:[%s469_s0 + $0x30] sm:$0xff] }
   0x4   :  { %v21_v13 = vmax.f32 %v18_v6, %v20_v9  ;;  %v38_v14 = vsel %vm19_vm1, %v14_v10, -inf  ;;  %v16_v15 = vld [vmem:[%s469_s0 + $0x38] sm:$0x3]  ;;  %v46_v16 = vsel %vm17_vm0, %v15_v12, -inf }
   0x5   :  { %v31_v17 = vrot.slane %v30_v8, 4  ;;  %v39_v18 = vmax.f32 %v37_v11, %v38_v14  ;;  %v47_v19 = vsel %vm19_vm1, %v16_v15, -inf }
   0x6   :  { %6 = vsyncpa [#allocation3], 0  ;;  %v22_v20 = vrot.slane %v21_v13, 4  ;;  %v48_v21 = vmax.f32 %v46_v16, %v47_v19  ;;  %vm198_vm2 = vcmask 130112   ;;  %vm227_vm3 = vcmask 1041409   ;;  %s329_s24 = scalar_lea.hbm %s470_s1, 16 }
   0x7   :  { %v32_v22 = vmax.f32 %v30_v8, %v31_v17  ;;  %v40_v23 = vrot.slane %v39_v18, 4  ;;  %vm229_vm4 = vcmask 1042434   ;;  %vm231_vm5 = vcmask 1043459   ;;  %p330_p0 = scmp.ne.s32.totalorder %s470_s1, %s329_s24  ;;  %p333_p1 = scmp.lt.u32.totalorder %s329_s24, %s470_s1 }
   0x8   :  { %v23_v24 = vmax.f32 %v21_v13, %v22_v20  ;;  %v49_v25 = vrot.slane %v48_v21, 4  ;;  %vm234_vm6 = vcmask 76800   ;;  %vm276_vm8 = vcmask 3072  }
   0x9   :  { %v33_v26 = vrot.slane %v32_v22, 2  ;;  %v41_v27 = vmax.f32 %v39_v18, %v40_v23  ;;  %p335_p2 = pnand %p333_p1, %p330_p0 }
   0xa   :  { %v24_v28 = vrot.slane %v23_v24, 2  ;;  %v50_v29 = vmax.f32 %v48_v21, %v49_v25 }
   0xb   :  { %v34_v30 = vmax.f32 %v32_v22, %v33_v26  ;;  %v42_v31 = vrot.slane %v41_v27, 2 }
   0xc   :  { %v25_v32 = vmax.f32 %v23_v24, %v24_v28  ;;  %v51_v33 = vrot.slane %v50_v29, 2 }
   0xd   :  { %v35_v34 = vrot.slane %v34_v30, 1  ;;  %v43_v35 = vmax.f32 %v41_v27, %v42_v31 }
   0xe   :  { %v26_v36 = vrot.slane %v25_v32, 1  ;;  %v52_v37 = vmax.f32 %v50_v29, %v51_v33 }
   0xf   :  { %v36_v38 = vmax.f32 %v34_v30, %v35_v34  ;;  %v44_v39 = vrot.slane %v43_v35, 1 }
  0x10   :  { %v27_v40 = vmax.f32 %v25_v32, %v26_v36  ;;  %v53_v41 = vrot.slane %v52_v37, 1 }
  0x11   :  { %v384_v42 = vsub.f32 %v11_v0, %v36_v38  ;;  %v386_v43 = vsub.f32 %v12_v1, %v36_v38  ;;  %v45_v44 = vmax.f32 %v43_v35, %v44_v39 }
  0x12   :  { %v388_v45 = vsub.f32 %v9_v2, %v27_v40  ;;  %v390_v46 = vsub.f32 %v10_v5, %v27_v40  ;;  %v54_v47 = vmax.f32 %v52_v37, %v53_v41 }
  0x13   :  { %v67_v48 = vmul.f32 1.442695, %v384_v42  ;;  %v69_v49 = vmul.f32 1.442695, %v386_v43  ;;  %v394_v50 = vsub.f32 %v13_v7, %v45_v44  ;;  %v396_v51 = vsub.f32 %v14_v10, %v45_v44 }
  0x14   :  { %v63_v52 = vmul.f32 1.442695, %v388_v45  ;;  %v65_v53 = vmul.f32 1.442695, %v390_v46  ;;  %v400_v54 = vsub.f32 %v15_v12, %v54_v47  ;;  %v402_v55 = vsub.f32 %v16_v15, %v54_v47 }
  0x15   :  { %305 = vpow2.f32 %v67_v48  ;;  %v71_v56 = vmul.f32 1.442695, %v394_v50  ;;  %v73_v57 = vmul.f32 1.442695, %v396_v51 }
  0x16   :  { %307 = vpow2.f32 %v69_v49  ;;  %v75_v58 = vmul.f32 1.442695, %v400_v54  ;;  %v77_v59 = vmul.f32 1.442695, %v402_v55 }
  0x17   :  { %309 = vpow2.f32 %v63_v52 }
  0x18   :  { %311 = vpow2.f32 %v65_v53 }
  0x19   :  { %313 = vpow2.f32 %v71_v56 }
  0x1a   :  { %315 = vpow2.f32 %v73_v57 }
  0x1b   :  { %317 = vpow2.f32 %v75_v58 }
  0x1c   :  { %319 = vpow2.f32 %v77_v59 }
  0x1f   :  { %v306_v60 = vpop.eup %305 }
  0x20   :  { %v308_v61 = vpop.eup %307  ;;  %v88_v62 = vsel %vm17_vm0, %v306_v60, 0.0 }
  0x21   :  { %v310_v63 = vpop.eup %309  ;;  %v89_v0 = vsel %vm19_vm1, %v308_v61, 0.0 }
  0x22   :  { %v312_v1 = vpop.eup %311  ;;  %v90_v2 = vadd.f32 %v89_v0, %v88_v62  ;;  %v79_v3 = vsel %vm17_vm0, %v310_v63, 0.0 }
  0x23   :  { %v314_v4 = vpop.eup %313  ;;  %v80_v5 = vsel %vm19_vm1, %v312_v1, 0.0 }
  0x24   :  { %v316_v6 = vpop.eup %315  ;;  %v91_v7 = vrot.slane %v90_v2, 4  ;;  %v81_v8 = vadd.f32 %v80_v5, %v79_v3  ;;  %v97_v9 = vsel %vm17_vm0, %v314_v4, 0.0  ;;  %v187_v3 = vlaneseq }
  0x25   :  { %v318_v10 = vpop.eup %317  ;;  %v98_v11 = vsel %vm19_vm1, %v316_v6, 0.0 }
  0x26   :  { %v320_v12 = vpop.eup %319  ;;  %v92_v13 = vadd.f32 %v91_v7, %v90_v2  ;;  %v82_v14 = vrot.slane %v81_v8, 4  ;;  %v99_v15 = vadd.f32 %v98_v11, %v97_v9  ;;  %v106_v16 = vsel %vm17_vm0, %v318_v10, 0.0 }
  0x27   :  { %v107_v17 = vsel %vm19_vm1, %v320_v12, 0.0  ;;  %v438_v7 = vshrl.u32 %v187_v3, 7 }
  0x28   :  { %v93_v18 = vrot.slane %v92_v13, 2  ;;  %v83_v19 = vadd.f32 %v82_v14, %v81_v8  ;;  %v100_v20 = vrot.slane %v99_v15, 4  ;;  %v108_v21 = vadd.f32 %v107_v17, %v106_v16 }
  0x29   :  { %vm263_vm7 = vcmp.lt.s32.totalorder %v438_v7, 4 }
  0x2a   :  { %v94_v22 = vadd.f32 %v93_v18, %v92_v13  ;;  %v84_v23 = vrot.slane %v83_v19, 2  ;;  %v101_v24 = vadd.f32 %v100_v20, %v99_v15  ;;  %v109_v25 = vrot.slane %v108_v21, 4 }
  0x2c   :  { %v95_v26 = vrot.slane %v94_v22, 1  ;;  %v85_v27 = vadd.f32 %v84_v23, %v83_v19  ;;  %v102_v28 = vrot.slane %v101_v24, 2  ;;  %v110_v29 = vadd.f32 %v109_v25, %v108_v21 }
  0x2e   :  { %v96_v30 = vadd.f32 %v95_v26, %v94_v22  ;;  %v86_v31 = vrot.slane %v85_v27, 1  ;;  %v103_v32 = vadd.f32 %v102_v28, %v101_v24  ;;  %v111_v33 = vrot.slane %v110_v29, 2 }
  0x30   :  { %321 = vlog2.f32 %v96_v30  ;;  %v87_v34 = vadd.f32 %v86_v31, %v85_v27  ;;  %v104_v35 = vrot.slane %v103_v32, 1  ;;  %v112_v36 = vadd.f32 %v111_v33, %v110_v29 }
  0x32   :  { %323 = vlog2.f32 %v87_v34  ;;  %v105_v37 = vadd.f32 %v104_v35, %v103_v32  ;;  %v113_v38 = vrot.slane %v112_v36, 1 }
  0x34   :  { %325 = vlog2.f32 %v105_v37  ;;  %v114_v39 = vadd.f32 %v113_v38, %v112_v36 }
  0x36   :  { %327 = vlog2.f32 %v114_v39 }
  0x3a   :  { %v322_v40 = vpop.eup %321 }
  0x3b   :  { %v118_v41 = vmul.f32 0.6931472, %v322_v40 }
  0x3c   :  { %v324_v44 = vpop.eup %323 }
  0x3d   :  { %v417_v47 = vsub.f32 %v384_v42, %v118_v41  ;;  %v116_v48 = vmul.f32 0.6931472, %v324_v44  ;;  %v126_v49 = vsub.f32 %v386_v43, %v118_v41 }
  0x3e   :  { %v326_v52 = vpop.eup %325 }
  0x3f   :  { %v161_v53 = vsel %vm17_vm0, %v417_v47, 0.0  ;;  %v423_v56 = vsub.f32 %v388_v45, %v116_v48  ;;  %v124_v58 = vsub.f32 %v390_v46, %v116_v48  ;;  %v120_v59 = vmul.f32 0.6931472, %v326_v52 }
  0x40   :  { %v328_v57 = vpop.eup %327  ;;  %162 = vadd.xlane.f32.xlu1 %v161_v53  ;;  %v164_v42 = vsel %vm19_vm1, %v126_v49, 0.0  ;;  %v132_v33 = vmul.f32 9.0, %v417_v47 }
  0x41   :  { %v155_v60 = vsel %vm17_vm0, %v423_v56, 0.0  ;;  %v122_v61 = vmul.f32 0.6931472, %v328_v57  ;;  %v128_v43 = vsub.f32 %v396_v51, %v120_v59  ;;  %v158_v62 = vsel %vm19_vm1, %v124_v58, 0.0 }
  0x42   :  { %156 = vadd.xlane.f32.xlu0 %v155_v60  ;;  %v127_v63 = vsub.f32 %v394_v50, %v120_v59  ;;  %v188_v50 = vand.u32 127, %v187_v3  ;;  %v131_v30 = vmul.f32 9.0, %v423_v56  ;;  %v140_v37 = vrot.slane %v132_v33, 7 }
  0x43   :  { %v170_v45 = vsel %vm19_vm1, %v128_v43, 0.0  ;;  %v130_v0 = vsub.f32 %v402_v55, %v122_v61  ;;  %v129_v1 = vsub.f32 %v400_v54, %v122_v61 }
  0x44   :  { %165 = vadd.xlane.f32.xlu1 %v164_v42  ;;  %v167_v46 = vsel %vm17_vm0, %v127_v63, 0.0  ;;  %v193_v5 = vadd.s32 4294967288, %v188_v50  ;;  %v191_v54 = vsub.s32 %v188_v50, %v438_v7  ;;  %v133_v31 = vmul.f32 9.0, %v127_v63 }
  0x45   :  { %v176_v2 = vsel %vm19_vm1, %v130_v0, 0.0  ;;  %v173_v51 = vsel %vm17_vm0, %v129_v1, 0.0  ;;  %v134_v32 = vmul.f32 9.0, %v129_v1  ;;  %v139_v34 = vrot.slane %v131_v30, 7 }
  0x46   :  { %159 = vadd.xlane.f32.xlu0 %v158_v62  ;;  %v196_v8 = vsub.s32 %v193_v5, %v438_v7  ;;  %v141_v35 = vrot.slane %v133_v31, 7  ;;  %v148_v41 = vadd.f32 %v140_v37, %v417_v47 }
  0x47   :  { %v142_v36 = vrot.slane %v134_v32, 7  ;;  %v147_v38 = vadd.f32 %v139_v34, %v423_v56 }
  0x48   :  { %171 = vadd.xlane.f32.xlu1 %v170_v45  ;;  %v149_v39 = vadd.f32 %v141_v35, %v127_v63  ;;  %v152_v57 = vsub.f32 0.0, %v148_v41 }
  0x49   :  { %v150_v40 = vadd.f32 %v142_v36, %v129_v1  ;;  %v151_v44 = vsub.f32 0.0, %v147_v38 }
  0x4a   :  { %168 = vadd.xlane.f32.xlu0 %v167_v46  ;;  %v153_v49 = vsub.f32 0.0, %v149_v39  ;;  %v242_v43 = vmul.f32 0.9, %v152_v57 }
  0x4b   :  { %v154_v53 = vsub.f32 0.0, %v150_v40  ;;  %v241_v59 = vmul.f32 0.9, %v151_v44 }
  0x4c   :  { %177 = vadd.xlane.f32.xlu1 %v176_v2  ;;  %v243_v60 = vmul.f32 0.9, %v153_v49 }
  0x4d   :  { %v244_v61 = vmul.f32 0.9, %v154_v53 }
  0x4e   :  { %174 = vadd.xlane.f32.xlu0 %v173_v51 }
  0xcd   :  { %v163_v4 = vpop.xlane.xlu1 %162 }
  0xce   :  { %v203_v15 = vrot.slane %v163_v4, %v191_v54 }
  0xcf   :  { %v157_v6 = vpop.xlane.xlu0 %156 }
  0xd0   :  { %v192_v16 = vrot.slane %v157_v6, %v191_v54 }
  0xd1   :  { %v166_v55 = vpop.xlane.xlu1 %165 }
  0xd2   :  { %v207_v11 = vrot.slane %v166_v55, %v196_v8 }
  0xd3   :  { %v160_v9 = vpop.xlane.xlu0 %159 }
  0xd4   :  { %v197_v12 = vrot.slane %v160_v9, %v196_v8  ;;  %v208_v19 = vsel %vm198_vm2, %v207_v11, %v203_v15 }
  0xd5   :  { %v172_v10 = vpop.xlane.xlu1 %171 }
  0xd6   :  { %v216_v13 = vrot.slane %v172_v10, %v196_v8  ;;  %v199_v20 = vsel %vm198_vm2, %v197_v12, %v192_v16 }
  0xd7   :  { %v169_v14 = vpop.xlane.xlu0 %168  ;;  %v228_v25 = vsel %vm227_vm3, %v208_v19, %v199_v20 }
  0xd8   :  { %v212_v17 = vrot.slane %v169_v14, %v191_v54 }
  0xd9   :  { %v178_v18 = vpop.xlane.xlu1 %177 }
  0xda   :  { %v225_v21 = vrot.slane %v178_v18, %v196_v8  ;;  %v217_v22 = vsel %vm198_vm2, %v216_v13, %v212_v17 }
  0xdb   :  { %v175_v23 = vpop.xlane.xlu0 %174  ;;  %v230_v27 = vsel %vm229_vm4, %v217_v22, %v228_v25 }
  0xdc   :  { %v221_v24 = vrot.slane %v175_v23, %v191_v54 }
  0xde   :  { %v226_v26 = vsel %vm198_vm2, %v225_v21, %v221_v24 }
  0xdf   :  { %v232_v28 = vsel %vm231_vm5, %v226_v26, %v230_v27 }
  0xe0   :  { %v235_v29 = vsel %vm234_vm6, %v232_v28, 0.0 }
  0xe1   :  { %236 = vadd.xlane.f32.xlu0 %v235_v29 }
 0x16e   :  { %v237_v48 = vpop.xlane.xlu0 %236 }
 0x16f   :  { %v239_v52 = vmul.f32 0.1, %v237_v48 }
 0x171   :  { %v240_v58 = vsub.f32 0.0, %v239_v52 }
 0x173   :  { %v245_v42 = vmul.f32 0.1, %v240_v58 }
 0x175   :  { %v247_v62 = vrot.slane %v245_v42, 7  ;;  %v248_v45 = vrot.slane %v245_v42, 1  ;;  %v249_v0 = vrot.slane %v245_v42, 2  ;;  %v255_v1 = vadd.f32 %v245_v42, %v242_v43 }
 0x177   :  { %v254_v56 = vadd.f32 %v247_v62, %v241_v59  ;;  %v256_v63 = vadd.f32 %v248_v45, %v243_v60  ;;  %v257_v46 = vadd.f32 %v249_v0, %v244_v61 }
 0x179   :  { %v268_v47 = vrot.slane %v254_v56, 1  ;;  %v270_v2 = vrot.slane %v256_v63, 7  ;;  %v272_v3 = vrot.slane %v257_v46, 6 }
 0x17b   :  { %v269_v51 = vsel %vm227_vm3, %v255_v1, %v268_v47 }
 0x17c   :  { %v271_v50 = vsel %vm229_vm4, %v270_v2, %v269_v51 }
 0x17d   :  { %v273_v4 = vsel %vm231_vm5, %v272_v3, %v271_v50 }
 0x17e   :  { %v275_v5 = vsel %vm263_vm7, %v273_v4, 0.0 }
 0x17f   :  { %v277_v6 = vsel %vm276_vm8, %v275_v5, 0.0 }
 0x180   :  { %278 = vadd.xlane.f32.xlu1 %v277_v6 }
 0x20d   :  { %v279_v55 = vpop.xlane.xlu1 %278 }
 0x20e   :  { %v280_v8 = vrot.slane %v279_v55, 4 }
 0x210   :  { %v281_v9 = vadd.f32 %v280_v8, %v279_v55 }
 0x212   :  { %v282_v54 = vrot.slane %v281_v9, 2 }
 0x214   :  { %v283_v10 = vadd.f32 %v282_v54, %v281_v9 }
 0x216   :  { %v284_v11 = vrot.slane %v283_v10, 1 }
 0x218   :  { %v285_v12 = vadd.f32 %v284_v11, %v283_v10 }
 0x21a   :  { %302 = vpush %v285_v12 }
 0x24b   :  { %s303_s0 = spop %302 }
 0x24c   :  { %288 = sst [smem:[#allocation2]] %s303_s0 }
 0x24d   :  { %338 = shalt.err (!%p335_p2)
}
 0x24e   :  { %s341_s29 = smov [#allocation2]  }
 0x24f   :  { %296 = dma.smem_to_hbm %s341_s29, 16, %s470_s1, [#allocation3]  }
 0x250   :  { %339 = dma.done.wait [#allocation3], 16  }
 0x251   :  { %340 = vsyncadd [#allocation3], 4294967280 }
 0x252   :  { %300 = sfence }
 0x253   :  { %301 = vsyncpa [#allocation3], 1 }

</bundles_post_ra>
